<compile_context>
chip_gen: v7x
topology: tpu7x:2x2x1
jax: 0.10.0
libtpu: 0.0.40
codegen_flags: <defaults>
</compile_context>

<pallas_src>
import math

import jax
import jax.numpy as jnp
from jax.experimental import pallas as pl
from jax.experimental.pallas import tpu as pltpu


def _round_up(x, m):
    return ((x + m - 1) // m) * m


def _cdiv(a, b):
    return -(-a // b)


# --------------------------------------------------------------------------- #
# Kernels
# --------------------------------------------------------------------------- #

def _map_kernel(x_ref, w_ref, b_ref, o_ref, acc_ref):
    # out = x @ mu_w_t + bias, accumulated over the K (n_in) grid axis.
    k = pl.program_id(2)

    @pl.when(k == 0)
    def _():
        acc_ref[...] = jnp.zeros_like(acc_ref)

    acc_ref[...] += jnp.dot(x_ref[...], w_ref[...],
                            preferred_element_type=jnp.float32)

    @pl.when(k == pl.num_programs(2) - 1)
    def _():
        o_ref[...] = (acc_ref[...] + b_ref[...]).astype(o_ref.dtype)


def _sample_kernel(x_ref, w_ref, s2_ref, b_ref, eps_ref, o_ref,
                   mu_acc, var_acc):
    # mu  = x @ mu_w_t + bias
    # var = (x*x) @ sigma2_t + 1e-8     (sigma2 precomputed in the wrapper)
    # out = mu + sqrt(var) * eps
    k = pl.program_id(2)

    @pl.when(k == 0)
    def _():
        mu_acc[...] = jnp.zeros_like(mu_acc)
        var_acc[...] = jnp.zeros_like(var_acc)

    x = x_ref[...]
    xf = x.astype(jnp.float32)
    xsq = (xf * xf).astype(s2_ref.dtype)      # square in f32; cast only for MXU
    mu_acc[...] += jnp.dot(x, w_ref[...], preferred_element_type=jnp.float32)
    var_acc[...] += jnp.dot(xsq, s2_ref[...], preferred_element_type=jnp.float32)

    @pl.when(k == pl.num_programs(2) - 1)
    def _():
        var = var_acc[...] + 1e-8
        o_ref[...] = (mu_acc[...] + b_ref[...]
                      + jnp.sqrt(var) * eps_ref[...]).astype(o_ref.dtype)


# --------------------------------------------------------------------------- #
# Wrapper
# --------------------------------------------------------------------------- #

def vblinear_forward(x, mu_w_t, logsig2_w_t, bias, *, map_mode=True,
                     training=False, eps=None, key=None, seed=0,
                     matmul_dtype=jnp.bfloat16, out_dtype=None,
                     tb=None, tn=None, tk=None):
    """VBLinear forward pass.

    x:            (B, n_in)      activations.
    mu_w_t:       (n_in, n_out)  weight mean, PRE-TRANSPOSED canonical layout.
    logsig2_w_t:  (n_in, n_out)  log sigma^2, pre-transposed.
    bias:         (n_out,).
    eps:          optional (B, n_out) noise for deterministic sampling; if None
                  it is drawn from `key` (or PRNGKey(seed)) with jax.random.
    matmul_dtype: MXU operand dtype (default bf16; accumulation is always f32).
                  Use jnp.float32 if calibrated variance precision matters.
    out_dtype:    output dtype (default: x.dtype).
    """
    B, n_in = x.shape
    n_in_w, n_out = mu_w_t.shape
    assert n_in_w == n_in and logsig2_w_t.shape == (n_in, n_out)
    assert bias.shape == (n_out,)

    w_dtype = jnp.dtype(matmul_dtype)
    out_dtype = jnp.dtype(x.dtype if out_dtype is None else out_dtype)
    sample = (not map_mode) or training

    # ---- tile selection -------------------------------------------------- #
    # Batch (M) tile: up to 256 rows, minimal row padding.
    if tb is None:
        if B <= 256:
            tb = _round_up(B, 8)
        else:
            best = None
            for cand in (256, 128):               # larger first; strict '<'
                padded = _round_up(B, cand)
                if best is None or padded < best[0]:
                    best = (padded, cand)
            tb = best[1]
    else:
        tb = _round_up(max(int(tb), 8), 8)
    B_pad = _round_up(B, tb)

    # Output (N) tile: lane-dense multiple of 128, no divisibility requirement.
    if tn is None:
        n_out_128 = _round_up(n_out, 128)
        if n_out_128 <= 512:
            tn = n_out_128
        else:
            best = None
            for cand in (512, 384, 256):          # never below 256 here
                padded = _round_up(n_out, cand)
                if best is None or padded < best[0]:
                    best = (padded, cand)
            tn = best[1]
    else:
        tn = _round_up(max(int(tn), 128), 128)
    n_out_pad = _round_up(n_out, tn)

    # Reduction (K) tile: full n_in when small, otherwise split into ~2K chunks
    # so VMEM does not scale with n_in (accumulated in f32 scratch).
    K_BLOCK = 2048
    if tk is None:
        if n_in <= K_BLOCK:
            nk, tk, n_in_pad = 1, n_in, n_in
        else:
            nk = _cdiv(n_in, K_BLOCK)
            tk = _round_up(_cdiv(n_in, nk), 128)
            n_in_pad = tk * nk
    else:
        tk = _round_up(max(int(tk), 128), 128)
        if tk >= n_in:
            nk, tk, n_in_pad = 1, n_in, n_in
        else:
            nk = _cdiv(n_in, tk)
            n_in_pad = tk * nk

    # ---- operand prep (one wrapper pass) --------------------------------- #
    x_p = x.astype(w_dtype)                       # cast ONCE, not per grid step
    muw = mu_w_t.astype(w_dtype)
    b2 = bias.astype(jnp.float32).reshape(1, n_out)

    s2 = None
    eps_p = None
    if sample:
        # sigma2 precomputed once (removes in-kernel EUP exp + VMEM scratch).
        s2 = jnp.exp(jnp.clip(logsig2_w_t.astype(jnp.float32),
                              -11.0, 11.0)).astype(w_dtype)
        if eps is None:
            if key is None:
                key = jax.random.PRNGKey(int(seed))
            eps = jax.random.normal(key, (B, n_out), dtype=jnp.float32)
        eps_p = eps.astype(jnp.float32)

    pad_b, pad_k, pad_o = B_pad - B, n_in_pad - n_in, n_out_pad - n_out
    if pad_b or pad_k:
        x_p = jnp.pad(x_p, ((0, pad_b), (0, pad_k)))
    if pad_k or pad_o:
        muw = jnp.pad(muw, ((0, pad_k), (0, pad_o)))
    if pad_o:
        b2 = jnp.pad(b2, ((0, 0), (0, pad_o)))
    if sample:
        if pad_k or pad_o:
            s2 = jnp.pad(s2, ((0, pad_k), (0, pad_o)))
        if pad_b or pad_o:
            eps_p = jnp.pad(eps_p, ((0, pad_b), (0, pad_o)))

    # ---- grid order: re-stream whichever operand is smaller -------------- #
    I = B_pad // tb
    J = n_out_pad // tn
    xw = w_dtype.itemsize
    x_bytes = B_pad * n_in_pad * xw
    w_bytes = n_in_pad * n_out_pad * xw * (2 if sample else 1)
    batch_inner = (x_bytes * J + w_bytes) <= (x_bytes + w_bytes * I)

    if batch_inner:                               # weights resident per out-tile
        grid = (J, I, nk)
        def bidx(a, b, k): return b
        def oidx(a, b, k): return a
    else:                                         # x resident per batch-tile
        grid = (I, J, nk)
        def bidx(a, b, k): return a
        def oidx(a, b, k): return b

    x_spec = pl.BlockSpec((tb, tk), lambda a, b, k: (bidx(a, b, k), k))
    w_spec = pl.BlockSpec((tk, tn), lambda a, b, k: (k, oidx(a, b, k)))
    s2_spec = pl.BlockSpec((tk, tn), lambda a, b, k: (k, oidx(a, b, k)))
    b_spec = pl.BlockSpec((1, tn), lambda a, b, k: (0, oidx(a, b, k)))
    o_spec = pl.BlockSpec((tb, tn), lambda a, b, k: (bidx(a, b, k), oidx(a, b, k)))
    eps_spec = pl.BlockSpec((tb, tn), lambda a, b, k: (bidx(a, b, k), oidx(a, b, k)))

    # ---- VMEM budget (tile caps keep this well under 64 MiB on v7x) ------ #
    # TODO(synk): raise tiles further on v5e/v6e (128 MiB VMEM) via a
    #             generation query; conservative caps are used for portability.
    ob = out_dtype.itemsize
    vmem_est = (2 * tb * tk * xw                  # x (double-buffered)
                + 2 * tk * tn * xw                # mu_w
                + 2 * 8 * tn * 4                  # bias
                + 2 * tb * tn * ob                # out
                + tb * tn * 4)                    # accumulator scratch
    if sample:
        vmem_est += 2 * tk * tn * xw              # sigma2
        vmem_est += 2 * tb * tn * 4               # eps
        vmem_est += tb * tn * 4                   # second accumulator
    vmem_limit = int(min(56 * 2**20, max(32 * 2**20, vmem_est + (4 << 20))))

    compiler_params = pltpu.CompilerParams(
        dimension_semantics=("parallel", "parallel", "arbitrary"),
        vmem_limit_bytes=vmem_limit)
    out_shape = jax.ShapeDtypeStruct((B_pad, n_out_pad), out_dtype)

    if not sample:
        out = pl.pallas_call(
            _map_kernel,
            out_shape=out_shape,
            grid_spec=pltpu.PrefetchScalarGridSpec(
                num_scalar_prefetch=0,
                grid=grid,
                in_specs=[x_spec, w_spec, b_spec],
                out_specs=o_spec,
                scratch_shapes=[pltpu.VMEM((tb, tn), jnp.float32)]),
            compiler_params=compiler_params,
        )(x_p, muw, b2)
    else:
        out = pl.pallas_call(
            _sample_kernel,
            out_shape=out_shape,
            grid_spec=pltpu.PrefetchScalarGridSpec(
                num_scalar_prefetch=0,
                grid=grid,
                in_specs=[x_spec, w_spec, s2_spec, b_spec, eps_spec],
                out_specs=o_spec,
                scratch_shapes=[pltpu.VMEM((tb, tn), jnp.float32),
                                pltpu.VMEM((tb, tn), jnp.float32)]),
            compiler_params=compiler_params,
        )(x_p, muw, s2, b2, eps_p)

    if (B_pad, n_out_pad) != (B, n_out):
        out = out[:B, :n_out]
    return out


# --------------------------------------------------------------------------- #
# Pure-JAX reference (PyTorch semantics) and self-test
# --------------------------------------------------------------------------- #

def _reference_forward(x, mu_w_t, logsig2_w_t, bias, *, sample, eps=None):
    mu_out = x @ mu_w_t + bias
    if not sample:
        return mu_out
    s2_w = jnp.exp(jnp.clip(logsig2_w_t, -11.0, 11.0))
    var_out = (x * x) @ s2_w + 1e-8
    return mu_out + jnp.sqrt(var_out) * eps


def _make_params(key, n_in, n_out):
    k_mu, k_ls, k_b = jax.random.split(key, 3)
    stdv = 1.0 / math.sqrt(n_in)
    mu_w_t = (stdv * jax.random.normal(k_mu, (n_out, n_in), dtype=jnp.float32)).T
    logsig2_w_t = (-9.0 + 0.001 * jax.random.normal(
        k_ls, (n_out, n_in), dtype=jnp.float32)).T
    bias = 0.01 * jax.random.normal(k_b, (n_out,), dtype=jnp.float32)
    return mu_w_t, logsig2_w_t, bias


if __name__ == "__main__":
    root = jax.random.PRNGKey(0)
    k_p1, k_x, k_eps, k_xodd, k_noise, k_p2, k_x2, k_eps2, k_p3, k_x3 = \
        jax.random.split(root, 10)

    # ---- case A: n_in=32, n_out=64, B=16 -------------------------------- #
    n_in, n_out, B = 32, 64, 16
    mu_w_t, logsig2_w_t, bias = _make_params(k_p1, n_in, n_out)
    x = jax.random.normal(k_x, (B, n_in), dtype=jnp.float32)

    # 1) MAP path, f32 operands (exact).
    y = vblinear_forward(x, mu_w_t, logsig2_w_t, bias, map_mode=True,
                         training=False, matmul_dtype=jnp.float32)
    jax.block_until_ready(y)
    y_ref = _reference_forward(x, mu_w_t, logsig2_w_t, bias, sample=False)
    assert y.shape == (B, n_out)
    assert jnp.allclose(y, y_ref, atol=1e-5, rtol=1e-5)

    # 2) MAP path, default bf16 MXU operands (loose tolerance).
    y_bf = vblinear_forward(x, mu_w_t, logsig2_w_t, bias, map_mode=True,
                            training=False)
    jax.block_until_ready(y_bf)
    assert jnp.allclose(y_bf, y_ref, atol=1e-1, rtol=1e-1)

    # 3) MAP path with batch not a multiple of 8 (row-padding path), f32.
    x_odd = jax.random.normal(k_xodd, (13, n_in), dtype=jnp.float32)
    y_odd = vblinear_forward(x_odd, mu_w_t, logsig2_w_t, bias, map_mode=True,
                             training=False, matmul_dtype=jnp.float32)
    jax.block_until_ready(y_odd)
    y_odd_ref = _reference_forward(x_odd, mu_w_t, logsig2_w_t, bias, sample=False)
    assert y_odd.shape == (13, n_out)
    assert jnp.allclose(y_odd, y_odd_ref, atol=1e-5, rtol=1e-5)

    # 4) Sampling path with explicit eps, f32 (exact, deterministic).
    eps = jax.random.normal(k_eps, (B, n_out), dtype=jnp.float32)
    y_s = vblinear_forward(x, mu_w_t, logsig2_w_t, bias, map_mode=True,
                           training=True, eps=eps, matmul_dtype=jnp.float32)
    jax.block_until_ready(y_s)
    y_s_ref = _reference_forward(x, mu_w_t, logsig2_w_t, bias, sample=True,
                                 eps=eps)
    assert jnp.allclose(y_s, y_s_ref, atol=1e-5, rtol=1e-5)

    # 5) Sampling path with wrapper-generated eps (default bf16); the eps draw
    #    is reproducible from the key, so compare against the same draw.
    y_k = vblinear_forward(x, mu_w_t, logsig2_w_t, bias, map_mode=False,
                           training=False, key=k_noise)
    jax.block_until_ready(y_k)
    eps_k = jax.random.normal(k_noise, (B, n_out), dtype=jnp.float32)
    y_k_ref = _reference_forward(x, mu_w_t, logsig2_w_t, bias, sample=True,
                                 eps=eps_k)
    assert jnp.allclose(y_k, y_k_ref, atol=1e-1, rtol=1e-1)

    # ---- case B: K-tiling (nk > 1) + column padding, sample path, f32 ---- #
    n_in2, n_out2, B2 = 256, 200, 24
    mu_w_t2, logsig2_w_t2, bias2 = _make_params(k_p2, n_in2, n_out2)
    x2 = jax.random.normal(k_x2, (B2, n_in2), dtype=jnp.float32)
    eps2 = jax.random.normal(k_eps2, (B2, n_out2), dtype=jnp.float32)
    y2 = vblinear_forward(x2, mu_w_t2, logsig2_w_t2, bias2, map_mode=True,
                          training=True, eps=eps2, matmul_dtype=jnp.float32,
                          tk=128)                       # force nk=2
    jax.block_until_ready(y2)
    y2_ref = _reference_forward(x2, mu_w_t2, logsig2_w_t2, bias2, sample=True,
                                eps=eps2)
    assert y2.shape == (B2, n_out2)
    assert jnp.allclose(y2, y2_ref, atol=1e-5, rtol=1e-5)

    # ---- case C: multiple out-tiles (J > 1, out-inner grid order), MAP f32 #
    n_in3, n_out3, B3 = 64, 256, 8
    mu_w_t3, logsig2_w_t3, bias3 = _make_params(k_p3, n_in3, n_out3)
    x3 = jax.random.normal(k_x3, (B3, n_in3), dtype=jnp.float32)
    y3 = vblinear_forward(x3, mu_w_t3, logsig2_w_t3, bias3, map_mode=True,
                          training=False, matmul_dtype=jnp.float32, tn=128)
    jax.block_until_ready(y3)
    y3_ref = _reference_forward(x3, mu_w_t3, logsig2_w_t3, bias3, sample=False)
    assert jnp.allclose(y3, y3_ref, atol=1e-5, rtol=1e-5)

    print("KERNEL_OK")
</pallas_src>

<mosaic_0001>
module attributes {stable_mosaic.version = 11 : i64} {
  func.func @_map_kernel(%arg0: i32, %arg1: i32, %arg2: i32, %arg3: memref<16x32xf32, #tpu.memory_space<vmem>>, %arg4: memref<32x128xf32, #tpu.memory_space<vmem>>, %arg5: memref<1x128xf32, #tpu.memory_space<vmem>>, %arg6: memref<16x128xf32, #tpu.memory_space<vmem>>, %arg7: memref<16x128xf32, #tpu.memory_space<vmem>>) attributes {dimension_semantics = [#tpu.dimension_semantics<parallel>, #tpu.dimension_semantics<parallel>, #tpu.dimension_semantics<arbitrary>], iteration_bounds = array<i64: 1, 1, 1>, scalar_prefetch = 0 : i64, scratch_operands = 1 : i64, tpu.core_type = #tpu.core_type<tc>, window_params = [{transform_indices = @transform_0, window_bounds = array<i64: 16, 32>}, {transform_indices = @transform_1, window_bounds = array<i64: 32, 128>}, {transform_indices = @transform_2, window_bounds = array<i64: 1, 128>}, {transform_indices = @transform_3, window_bounds = array<i64: 16, 128>}]} {
    %c0_i32 = arith.constant 0 : i32
    %0 = arith.cmpi eq, %arg2, %c0_i32 : i32
    %1 = arith.extui %0 : i1 to i32
    %c0_i32_0 = arith.constant 0 : i32
    %2 = arith.cmpi ne, %1, %c0_i32_0 : i32
    scf.if %2 {
      %cst_10 = arith.constant 0.000000e+00 : f32
      %12 = vector.broadcast %cst_10 : f32 to vector<16x128xf32>
      %c0_11 = arith.constant 0 : index
      %c0_12 = arith.constant 0 : index
      %13 = vector.load %arg7[%c0_11, %c0_12] : memref<16x128xf32, #tpu.memory_space<vmem>>, vector<16x128xf32>
      tpu.vector_store %arg7[%c0_11, %c0_12], %12 {strides = array<i32>} : memref<16x128xf32, #tpu.memory_space<vmem>>, vector<16x128xf32>,
    } else {
    }
    %c0 = arith.constant 0 : index
    %c0_1 = arith.constant 0 : index
    %3 = vector.load %arg7[%c0, %c0_1] : memref<16x128xf32, #tpu.memory_space<vmem>>, vector<16x128xf32>
    %c0_2 = arith.constant 0 : index
    %c0_3 = arith.constant 0 : index
    %4 = vector.load %arg3[%c0_2, %c0_3] : memref<16x32xf32, #tpu.memory_space<vmem>>, vector<16x32xf32>
    %c0_4 = arith.constant 0 : index
    %c0_5 = arith.constant 0 : index
    %5 = vector.load %arg4[%c0_4, %c0_5] : memref<32x128xf32, #tpu.memory_space<vmem>>, vector<32x128xf32>
    %cst = arith.constant dense<0.000000e+00> : vector<16x128xf32>
    %6 = tpu.matmul %4, %5, %cst {dimension_numbers = #tpu.dot_dimension_numbers<[1], [0], [0], [1], [0, 0, 1, 1], [], []>} : vector<16x32xf32>, vector<32x128xf32>, vector<16x128xf32> -> vector<16x128xf32>
    %7 = arith.addf %3, %6 : vector<16x128xf32>
    %c0_6 = arith.constant 0 : index
    %c0_7 = arith.constant 0 : index
    %8 = vector.load %arg7[%c0_6, %c0_7] : memref<16x128xf32, #tpu.memory_space<vmem>>, vector<16x128xf32>
    tpu.vector_store %arg7[%c0_6, %c0_7], %7 {strides = array<i32>} : memref<16x128xf32, #tpu.memory_space<vmem>>, vector<16x128xf32>,
    %c0_i32_8 = arith.constant 0 : i32
    %9 = arith.cmpi eq, %arg2, %c0_i32_8 : i32
    %10 = arith.extui %9 : i1 to i32
    %c0_i32_9 = arith.constant 0 : i32
    %11 = arith.cmpi ne, %10, %c0_i32_9 : i32
    scf.if %11 {
      %c0_10 = arith.constant 0 : index
      %c0_11 = arith.constant 0 : index
      %12 = vector.load %arg7[%c0_10, %c0_11] : memref<16x128xf32, #tpu.memory_space<vmem>>, vector<16x128xf32>
      %c0_12 = arith.constant 0 : index
      %c0_13 = arith.constant 0 : index
      %13 = vector.load %arg5[%c0_12, %c0_13] : memref<1x128xf32, #tpu.memory_space<vmem>>, vector<1x128xf32>
      %14 = vector.broadcast %13 : vector<1x128xf32> to vector<16x128xf32>
      %15 = arith.addf %12, %14 : vector<16x128xf32>
      %c0_14 = arith.constant 0 : index
      %c0_15 = arith.constant 0 : index
      %16 = vector.load %arg6[%c0_14, %c0_15] : memref<16x128xf32, #tpu.memory_space<vmem>>, vector<16x128xf32>
      tpu.vector_store %arg6[%c0_14, %c0_15], %15 {strides = array<i32>} : memref<16x128xf32, #tpu.memory_space<vmem>>, vector<16x128xf32>,
    } else {
    }
    return
  }
  func.func @transform_0(%arg0: i32, %arg1: i32, %arg2: i32) -> (i32, i32) {
    %c0_i32 = arith.constant 0 : i32
    return %arg1, %arg2 : i32, i32
  }
  func.func @transform_1(%arg0: i32, %arg1: i32, %arg2: i32) -> (i32, i32) {
    %c0_i32 = arith.constant 0 : i32
    return %arg2, %arg0 : i32, i32
  }
  func.func @transform_2(%arg0: i32, %arg1: i32, %arg2: i32) -> (i32, i32) {
    %c0_i32 = arith.constant 0 : i32
    %c0_i32_0 = arith.constant 0 : i32
    return %c0_i32, %arg0 : i32, i32
  }
  func.func @transform_3(%arg0: i32, %arg1: i32, %arg2: i32) -> (i32, i32) {
    %c0_i32 = arith.constant 0 : i32
    return %arg1, %arg0 : i32, i32
  }
}

</mosaic_0001>

<bundles_post_ra>
// kernel: tpu_custom_call.1
= control target key start
LH: loop header
LB: loop body
LE: loop exit
PB: predicated region body
PF: predicated region fallthrough
CT: control target
= control target key end

     0   :  { %8 = vsyncpa [#allocation4], 0  ;;  %s355_s0 = inlined_call_operand.hbm [shape: f32[16,32], index: 0, kind: input, shape index: {}]   ;;  %s356_s1 = inlined_call_operand.hbm [shape: f32[32,128], index: 1, kind: input, shape index: {}]   ;;  %s357_s2 = inlined_call_operand.vmem [shape: f32[1,128], index: 2, kind: input, shape index: {}]   ;;  %s358_s3 = inlined_call_operand.hbm [shape: f32[16,128], index: 3, kind: output, shape index: {}]  }
   0x1   :  { %9 = vsyncpa [#allocation7], 0 }
   0x2   :  { %10 = vsyncpa [#allocation5], 0  ;;  %s282_s12 = smov [#allocation3]   ;;  %s210_s16 = scalar_lea.hbm %s355_s0, 256 }
   0x3   :  { %s16_s13 = sshll.u32 %s282_s12, 4  ;;  %p211_p0 = scmp.ne.s32.totalorder %s355_s0, %s210_s16  ;;  %s17_s13 = int_to_ptr.vmem [resolvable:$true] %s16_s13 }
   0x4   :  { %p214_p1 = scmp.lt.u32.totalorder %s210_s16, %s355_s0 }
   0x6   :  { %p216_p2 = pnand %p214_p1, %p211_p0 }
   0x8   :  { %219 = shalt.err (!%p216_p2)
}
   0x9   :  { %s220_s21 = scalar_lea.vmem %s17_s13, 256  ;;  %p225_p4 = scmp.lt.s32.totalorder %s17_s13, %s17_s13 }
   0xa   :  { %p221_p3 = scmp.ne.s32.totalorder %s17_s13, %s220_s21  ;;  %p226_p5 = scmp.lt.s32.totalorder %s220_s21, %s220_s21 }
   0xc   :  { %p227_p6 = por %p226_p5, %p225_p4 }
   0xe   :  { %p228_p7 = pnand %p227_p6, %p221_p3 }
  0x10   :  { %231 = shalt.err (!%p228_p7)
}
  0x11   :  { %s283_s22 = smov 128   ;;  %s284_s23 = smov 8  }
  0x12   :  { %22 = dma.hbm_to_vmem [thread:$0]  %s355_s0, 256, %s17_s13, [#allocation4], %s283_s22, %s283_s22, %s284_s23  }
  0x13   :  { %s285_s26 = smov [#allocation6]   ;;  %s232_s30 = scalar_lea.hbm %s356_s1, 512 }
  0x14   :  { %s28_s27 = sshll.u32 %s285_s26, 4  ;;  %p233_p8 = scmp.ne.s32.totalorder %s356_s1, %s232_s30  ;;  %s29_s27 = int_to_ptr.vmem [resolvable:$true] %s28_s27 }
  0x15   :  { %p236_p9 = scmp.lt.u32.totalorder %s232_s30, %s356_s1 }
  0x17   :  { %p238_p10 = pnand %p236_p9, %p233_p8 }
  0x19   :  { %241 = shalt.err (!%p238_p10)
}
  0x1a   :  { %s242_s8 = scalar_lea.vmem %s29_s27, 512  ;;  %p247_p12 = scmp.lt.s32.totalorder %s29_s27, %s29_s27 }
  0x1b   :  { %p243_p11 = scmp.ne.s32.totalorder %s29_s27, %s242_s8  ;;  %p248_p13 = scmp.lt.s32.totalorder %s242_s8, %s242_s8 }
  0x1d   :  { %p249_p0 = por %p248_p13, %p247_p12 }
  0x1f   :  { %p250_p1 = pnand %p249_p0, %p243_p11 }
  0x21   :  { %253 = shalt.err (!%p250_p1)
}
  0x22   :  { %34 = dma.hbm_to_vmem [thread:$0]  %s356_s1, 512, %s29_s27, [#allocation7], %s283_s22, %s283_s22, %s284_s23  }
  0x23   :  { %276 = dma.done.wait [#allocation4], 256  }
  0x24   :  { %277 = vsyncadd [#allocation4], 4294967040 }
  0x25   :  { %278 = dma.done.wait [#allocation7], 512  }
  0x26   :  { %279 = vsyncadd [#allocation7], 4294966784  ;;  %vm57_vm0 = vcmask 261120   ;;  %v53_v0 = vld [vmem:[#allocation6] sm:$0xff]  ;;  %v54_v1 = vld [vmem:[#allocation6 + $0x8] sm:$0xff]  ;;  %s286_s11 = smov [#allocation8]  }
  0x27   :  { %v55_v2 = vld [vmem:[#allocation6 + $0x10] sm:$0xff]  ;;  %v197_v3 = vpack.c.bf16 %v54_v1, %v53_v0  ;;  %v56_v4 = vld [vmem:[#allocation6 + $0x18] sm:$0xff]  ;;  %s164_s12 = sshll.u32 %s286_s11, 4  ;;  %s165_s12 = int_to_ptr.vmem [resolvable:$true] %s164_s12 }
  0x28   :  { %v51_v5 = vld [vmem:[#allocation3] sm:$0xff]  ;;  %v201_v6 = vpack.c.bf16 %v56_v4, %v55_v2  ;;  %v52_v7 = vld [vmem:[#allocation3 + $0x8] sm:$0xff]  ;;  %s254_s13 = scalar_lea.vmem %s165_s12, 256  ;;  %p259_p3 = scmp.lt.s32.totalorder %s165_s12, %s165_s12 }
  0x29   :  { %194 = vmatprep.mubr.msk.f32.mxu0 %vm57_vm0, %v51_v5  ;;  %198 = vmatprep.subr.bf16.mxu0 %v197_v3  ;;  %v179_v8 = vld [vmem:[%s357_s2] ss:$0 sm:$0xff]  ;;  %p255_p2 = scmp.ne.s32.totalorder %s165_s12, %s254_s13  ;;  %p260_p4 = scmp.lt.s32.totalorder %s254_s13, %s254_s13 }
  0x2a   :  { %200 = vmatpush3.bf16.msra.mxu0 %v197_v3 }
  0x2b   :  { %202 = vmatprep.subr.bf16.mxu0 %v201_v6  ;;  %p261_p5 = por %p260_p4, %p259_p3 }
  0x2d   :  { %p262_p6 = pnand %p261_p5, %p255_p2 }
  0x2e   :  { %204 = vmatpush3.bf16.msra.mxu0 %v201_v6 }
  0x31   :  { %195 = vmatmul.mubr.msk.f32.vlgmr.msra.gmra.mrb[0].mxu0 %vm57_vm0, %v52_v7 }
 0x104   :  { %v196_v9 = vpop.f32.mrb[0].mxu0 }
 0x105   :  { %v156_v10 = vadd.f32 %v196_v9, %v179_v8  ;;  %v130_v11 = vpop.f32.mrb[1].mxu0 }
 0x106   :  { %v155_v12 = vadd.f32 %v179_v8, %v130_v11 }
 0x107   :  { %158 = vst [vmem:[#allocation8 + $0x8] sm:$0xff] %v156_v10 }
 0x108   :  { %157 = vst [vmem:[#allocation8] sm:$0xff] %v155_v12 }
 0x109   :  { %265 = shalt.err (!%p262_p6)
}
 0x10a   :  { %s266_s2 = scalar_lea.hbm %s358_s3, 256 }
 0x10b   :  { %p267_p7 = scmp.ne.s32.totalorder %s358_s3, %s266_s2  ;;  %p270_p8 = scmp.lt.u32.totalorder %s266_s2, %s358_s3 }
 0x10d   :  { %p272_p9 = pnand %p270_p8, %p267_p7 }
 0x10f   :  { %275 = shalt.err (!%p272_p9)
}
 0x110   :  { %170 = dma.vmem_to_hbm [thread:$0]  %s165_s12, 256, %s358_s3, [#allocation5], %s283_s22, %s283_s22, %s284_s23  }
 0x111   :  { %280 = dma.done.wait [#allocation5], 256  }
 0x112   :  { %281 = vsyncadd [#allocation5], 4294967040 }
 0x113   :  { %174 = vsyncpa [#allocation4], 1 }
 0x114   :  { %175 = vsyncpa [#allocation7], 1 }
 0x115   :  { %176 = vsyncpa [#allocation5], 1 }

</bundles_post_ra>
